<compile_context>
chip_gen: v7x
topology: tpu7x:2x2x1
jax: 0.10.0
libtpu: 0.0.40
codegen_flags: <defaults>
</compile_context>

<pallas_src>
import functools

import jax
import jax.numpy as jnp
from jax import lax
from jax.experimental import pallas as pl
from jax.experimental.pallas import tpu as pltpu


def _linear_relu_kernel(x_ref, w_ref, b_ref, o_ref):
    # x_ref: [tb, K], w_ref: [N, K] (torch layout), b_ref: [1, N], o_ref: [tb, N]
    # Contract on K with the RHS transposed in-place by the MXU (no data copy).
    acc = lax.dot_general(
        x_ref[...], w_ref[...],
        dimension_numbers=(((1,), (1,)), ((), ())),
        preferred_element_type=jnp.float32,
    )
    acc = acc + b_ref[...]               # broadcast (1, N) over (tb, N)
    o_ref[...] = jnp.maximum(acc, 0.0).astype(o_ref.dtype)
    # TODO(synk): log_softmax from the reference forward is dead code (the
    # module returns the pre-softmax ReLU activations), so it is not computed.


@functools.partial(jax.jit, static_argnames=())
def simple_linear_forward(x, weight, bias):
    """x: [B, C, H, W] (or any [B, ...]); weight: [out, in] torch layout; bias: [out]."""
    b = x.shape[0]
    x2d = x.reshape(b, -1).astype(jnp.float32)        # [B, K] (row-major == torch .view)
    w = weight.astype(jnp.float32)                    # [N, K]  -- NO transpose
    b2d = bias.astype(jnp.float32).reshape(1, -1)     # [1, N]

    B, K = x2d.shape
    N = w.shape[0]

    # Batch tiling: full batch when small, 256-row tiles otherwise.
    tb = B if B <= 256 else 256
    grid_b = pl.cdiv(B, tb)

    cost = pl.CostEstimate(
        flops=2 * B * K * N,
        bytes_accessed=4 * (B * K + N * K + N + B * N),
        transcendentals=0,
    )

    return pl.pallas_call(
        _linear_relu_kernel,
        out_shape=jax.ShapeDtypeStruct((B, N), jnp.float32),
        grid_spec=pl.GridSpec(
            grid=(grid_b,),
            in_specs=[
                pl.BlockSpec((tb, K), lambda i: (i, 0)),   # x tile per batch block
                pl.BlockSpec((N, K), lambda i: (0, 0)),    # full weight, lane-dense
                pl.BlockSpec((1, N), lambda i: (0, 0)),    # bias
            ],
            out_specs=pl.BlockSpec((tb, N), lambda i: (i, 0)),
        ),
        compiler_params=pltpu.CompilerParams(
            dimension_semantics=("parallel",)),   # megacore-shardable on v7x
        cost_estimate=cost,
    )(x2d, w, b2d)


if __name__ == "__main__":
    # Module config implied by the input: in_size = C*H*W, pick out_size = 32.
    B, C, H, W = 2, 4, 16, 16
    in_size = C * H * W        # 1024
    out_size = 32

    key = jax.random.PRNGKey(0)
    kx, kw, kb = jax.random.split(key, 3)

    x = jax.random.normal(kx, (B, C, H, W), dtype=jnp.float32)

    # Deterministic init mimicking nn.Linear defaults (uniform +/- 1/sqrt(in)).
    bound = 1.0 / jnp.sqrt(jnp.float32(in_size))
    weight = jax.random.uniform(kw, (out_size, in_size),
                                minval=-bound, maxval=bound, dtype=jnp.float32)
    bias = jax.random.uniform(kb, (out_size,),
                              minval=-bound, maxval=bound, dtype=jnp.float32)

    out = simple_linear_forward(x, weight, bias)
    jax.block_until_ready(out)

    # Sanity check against plain-JAX reference.
    ref = jnp.maximum(x.reshape(B, -1) @ weight.T + bias, 0.0)
    assert out.shape == (B, out_size)
    assert jnp.allclose(out, ref, atol=1e-5, rtol=1e-5)

    print("KERNEL_OK")
</pallas_src>

<mosaic_0001>
module attributes {stable_mosaic.version = 11 : i64} {
  func.func @_linear_relu_kernel(%arg0: i32, %arg1: memref<2x1024xf32, #tpu.memory_space<vmem>>, %arg2: memref<32x1024xf32, #tpu.memory_space<vmem>>, %arg3: memref<1x32xf32, #tpu.memory_space<vmem>>, %arg4: memref<2x32xf32, #tpu.memory_space<vmem>>) attributes {dimension_semantics = [#tpu.dimension_semantics<parallel>], iteration_bounds = array<i64: 1>, scalar_prefetch = 0 : i64, scratch_operands = 0 : i64, tpu.core_type = #tpu.core_type<tc>, window_params = [{transform_indices = @transform_0, window_bounds = array<i64: 2, 1024>}, {pipeline_mode = #tpu.pipeline_mode<synchronous>, transform_indices = @transform_1, window_bounds = array<i64: 32, 1024>}, {pipeline_mode = #tpu.pipeline_mode<synchronous>, transform_indices = @transform_2, window_bounds = array<i64: 1, 32>}, {transform_indices = @transform_3, window_bounds = array<i64: 2, 32>}]} {
    %c0 = arith.constant 0 : index
    %c0_0 = arith.constant 0 : index
    %0 = vector.load %arg1[%c0, %c0_0] : memref<2x1024xf32, #tpu.memory_space<vmem>>, vector<2x1024xf32>
    %c0_1 = arith.constant 0 : index
    %c0_2 = arith.constant 0 : index
    %1 = vector.load %arg2[%c0_1, %c0_2] : memref<32x1024xf32, #tpu.memory_space<vmem>>, vector<32x1024xf32>
    %cst = arith.constant dense<0.000000e+00> : vector<2x32xf32>
    %2 = tpu.matmul %0, %1, %cst {dimension_numbers = #tpu.dot_dimension_numbers<[1], [1], [0], [0], [0, 0, 1, 0], [], []>} : vector<2x1024xf32>, vector<32x1024xf32>, vector<2x32xf32> -> vector<2x32xf32>
    %c0_3 = arith.constant 0 : index
    %c0_4 = arith.constant 0 : index
    %3 = vector.load %arg3[%c0_3, %c0_4] : memref<1x32xf32, #tpu.memory_space<vmem>>, vector<1x32xf32>
    %4 = vector.broadcast %3 : vector<1x32xf32> to vector<2x32xf32>
    %5 = arith.addf %2, %4 : vector<2x32xf32>
    %cst_5 = arith.constant 0.000000e+00 : f32
    %6 = vector.broadcast %cst_5 : f32 to vector<2x32xf32>
    %7 = arith.maximumf %5, %6 : vector<2x32xf32>
    %c0_6 = arith.constant 0 : index
    %c0_7 = arith.constant 0 : index
    %8 = vector.load %arg4[%c0_6, %c0_7] : memref<2x32xf32, #tpu.memory_space<vmem>>, vector<2x32xf32>
    tpu.vector_store %arg4[%c0_6, %c0_7], %7 {strides = array<i32>} : memref<2x32xf32, #tpu.memory_space<vmem>>, vector<2x32xf32>,
    return
  }
  func.func @transform_0(%arg0: i32) -> (i32, i32) {
    %c0_i32 = arith.constant 0 : i32
    %c0_i32_0 = arith.constant 0 : i32
    return %arg0, %c0_i32 : i32, i32
  }
  func.func @transform_1(%arg0: i32) -> (i32, i32) {
    %c0_i32 = arith.constant 0 : i32
    %c0_i32_0 = arith.constant 0 : i32
    %c0_i32_1 = arith.constant 0 : i32
    return %c0_i32, %c0_i32_0 : i32, i32
  }
  func.func @transform_2(%arg0: i32) -> (i32, i32) {
    %c0_i32 = arith.constant 0 : i32
    %c0_i32_0 = arith.constant 0 : i32
    %c0_i32_1 = arith.constant 0 : i32
    return %c0_i32, %c0_i32_0 : i32, i32
  }
  func.func @transform_3(%arg0: i32) -> (i32, i32) {
    %c0_i32 = arith.constant 0 : i32
    %c0_i32_0 = arith.constant 0 : i32
    return %arg0, %c0_i32 : i32, i32
  }
}

</mosaic_0001>

<bundles_post_ra>
// kernel: simple_linear_forward.1
= control target key start
LH: loop header
LB: loop body
LE: loop exit
PB: predicated region body
PF: predicated region fallthrough
CT: control target
= control target key end

     0   :  { %8 = vsyncpa [#allocation3], 0  ;;  %s564_s0 = inlined_call_operand.vmem [shape: f32[2,1024], index: 0, kind: input, shape index: {}]   ;;  %s565_s1 = inlined_call_operand.hbm [shape: f32[32,1024], index: 1, kind: input, shape index: {}]   ;;  %s566_s2 = inlined_call_operand.vmem [shape: f32[1,32], index: 2, kind: input, shape index: {}]   ;;  %s567_s3 = inlined_call_operand.hbm [shape: f32[2,32], index: 3, kind: output, shape index: {}]  }
   0x1   :  { %9 = vsyncpa [#allocation4], 0  ;;  %s506_s12 = smov [#allocation2]   ;;  %s458_s16 = scalar_lea.hbm %s565_s1, 4096 }
   0x2   :  { %s17_s13 = sshll.u32 %s506_s12, 4  ;;  %p459_p0 = scmp.ne.s32.totalorder %s565_s1, %s458_s16  ;;  %s18_s13 = int_to_ptr.vmem [resolvable:$true] %s17_s13 }
   0x3   :  { %p462_p1 = scmp.lt.u32.totalorder %s458_s16, %s565_s1 }
   0x5   :  { %p464_p2 = pnand %p462_p1, %p459_p0 }
   0x7   :  { %467 = shalt.err (!%p464_p2)
}
   0x8   :  { %s468_s21 = scalar_lea.vmem %s18_s13, 4096  ;;  %p473_p4 = scmp.lt.s32.totalorder %s18_s13, %s18_s13 }
   0x9   :  { %p469_p3 = scmp.ne.s32.totalorder %s18_s13, %s468_s21  ;;  %p474_p5 = scmp.lt.s32.totalorder %s468_s21, %s468_s21 }
   0xb   :  { %p475_p6 = por %p474_p5, %p473_p4 }
   0xd   :  { %p476_p7 = pnand %p475_p6, %p469_p3 }
   0xf   :  { %479 = shalt.err (!%p476_p7)
}
  0x10   :  { %s507_s22 = smov 1024   ;;  %s508_s23 = smov 64  }
  0x11   :  { %23 = dma.hbm_to_vmem [thread:$0]  %s565_s1, 4096, %s18_s13, [#allocation3], %s507_s22, %s507_s22, %s508_s23  }
  0x12   :  { %502 = dma.done.wait [#allocation3], 4096  }
  0x13   :  { %503 = vsyncadd [#allocation3], 4294963200  ;;  %v509_v0 = vmov 1983009808   ;;  %v76_v2 = vlaneseq  ;;  %v32_v5 = vld [vmem:[#allocation2 + $0x8] sm:$0xff]  ;;  %v31_v10 = vld [vmem:[#allocation2] sm:$0xff] }
  0x14   :  { %v74_v1 = vunpack.c.l.s4 %v509_v0  ;;  %v40_v6 = vld [vmem:[#allocation2 + $0x48] sm:$0xff]  ;;  %v39_v11 = vld [vmem:[#allocation2 + $0x40] sm:$0xff]  ;;  %v34_v30 = vld [vmem:[#allocation2 + $0x18] sm:$0xff]  ;;  %s510_s30 = smov [#allocation5]   ;;  %vm395_vm0 = vcmask 254976  }
  0x15   :  { %v77_v4 = vshrl.u32 %v76_v2, 7  ;;  %v36_v7 = vld [vmem:[#allocation2 + $0x28] sm:$0xff]  ;;  %v413_v8 = vpack.c.bf16 %v40_v6, %v32_v5  ;;  %v415_v13 = vpack.c.bf16 %v39_v11, %v31_v10  ;;  %v35_v14 = vld [vmem:[#allocation2 + $0x20] sm:$0xff]  ;;  %v42_v31 = vld [vmem:[#allocation2 + $0x58] sm:$0xff]  ;;  %s403_s4 = sshll.u32 %s510_s30, 4  ;;  %s404_s4 = int_to_ptr.vmem [resolvable:$true] %s403_s4 }
  0x16   :  { %v75_v3 = vunpack.c.0.s8 %v74_v1  ;;  %v44_v9 = vld [vmem:[#allocation2 + $0x68] sm:$0xff]  ;;  %v43_v15 = vld [vmem:[#allocation2 + $0x60] sm:$0xff]  ;;  %v38_v34 = vld [vmem:[#allocation2 + $0x38] sm:$0xff]  ;;  %v421_v39 = vpack.c.bf16 %v42_v31, %v34_v30  ;;  %s480_s5 = scalar_lea.vmem %s404_s4, 32  ;;  %p485_p9 = scmp.lt.s32.totalorder %s404_s4, %s404_s4 }
  0x17   :  { %v429_v12 = vpack.c.bf16 %v44_v9, %v36_v7  ;;  %v48_v16 = vld [vmem:[#allocation2 + $0x88] sm:$0xff]  ;;  %414 = vmatprep.subr.bf16.mxu1 %v413_v8  ;;  %v431_v18 = vpack.c.bf16 %v43_v15, %v35_v14  ;;  %v47_v24 = vld [vmem:[#allocation2 + $0x80] sm:$0xff]  ;;  %v46_v35 = vld [vmem:[#allocation2 + $0x78] sm:$0xff]  ;;  %p481_p8 = scmp.ne.s32.totalorder %s404_s4, %s480_s5  ;;  %p486_p10 = scmp.lt.s32.totalorder %s480_s5, %s480_s5 }
  0x18   :  { %v78_v17 = vsub.s32 %v75_v3, %v77_v4  ;;  %v56_v19 = vld [vmem:[#allocation2 + $0xc8] sm:$0xff]  ;;  %416 = vmatpush1.bf16.xpose.msra.mxu1 %v415_v13  ;;  %v55_v25 = vld [vmem:[#allocation2 + $0xc0] sm:$0xff]  ;;  %v437_v42 = vpack.c.bf16 %v46_v35, %v38_v34  ;;  %v33_v44 = vld [vmem:[#allocation2 + $0x10] sm:$0xff] }
  0x19   :  { %v52_v20 = vld [vmem:[#allocation2 + $0xa8] sm:$0xff]  ;;  %430 = vmatprep.subr.bf16.mxu0 %v429_v12  ;;  %v417_v22 = vpack.c.bf16 %v56_v19, %v48_v16  ;;  %v51_v26 = vld [vmem:[#allocation2 + $0xa0] sm:$0xff]  ;;  %v419_v36 = vpack.c.bf16 %v55_v25, %v47_v24  ;;  %v41_v45 = vld [vmem:[#allocation2 + $0x50] sm:$0xff]  ;;  %p487_p11 = por %p486_p10, %p485_p9 }
  0x1a   :  { %v60_v21 = vld [vmem:[#allocation2 + $0xe8] sm:$0xff]  ;;  %432 = vmatpush1.bf16.xpose.msra.mxu0 %v431_v18  ;;  %v59_v27 = vld [vmem:[#allocation2 + $0xe0] sm:$0xff]  ;;  %v37_v46 = vld [vmem:[#allocation2 + $0x30] sm:$0xff]  ;;  %v423_v54 = vpack.c.bf16 %v41_v45, %v33_v44 }
  0x1b   :  { %v433_v23 = vpack.c.bf16 %v60_v21, %v52_v20  ;;  %v29_v28 = vld [vmem:[%s564_s0] sm:$0xff]  ;;  %418 = vmatprep.subr.bf16.mxu1 %v417_v22  ;;  %v30_v32 = vld [vmem:[%s564_s0 + $0x8] sm:$0xff]  ;;  %v435_v38 = vpack.c.bf16 %v59_v27, %v51_v26  ;;  %v45_v47 = vld [vmem:[#allocation2 + $0x70] sm:$0xff]  ;;  %p488_p12 = pnand %p487_p11, %p481_p8 }
  0x1c   :  { %v79_v29 = vrot.slane %v29_v28, %v78_v17  ;;  %v96_v33 = vrot.slane %v30_v32, %v78_v17  ;;  %v72_v41 = vcombine.high %v29_v28, %v29_v28  ;;  %v89_v43 = vcombine.high %v30_v32, %v30_v32  ;;  %v50_v48 = vld [vmem:[#allocation2 + $0x98] sm:$0xff]  ;;  %v49_v60 = vld [vmem:[#allocation2 + $0x90] sm:$0xff]  ;;  %v412_v2 = vld [vmem:[%s566_s2] ss:$0 sm:$0xff] }
  0x1d   :  { %434 = vmatprep.subr.bf16.mxu0 %v433_v23  ;;  %v58_v49 = vld [vmem:[#allocation2 + $0xd8] sm:$0xff]  ;;  %v439_v55 = vpack.c.bf16 %v45_v47, %v37_v46  ;;  %v57_v61 = vld [vmem:[#allocation2 + $0xd0] sm:$0xff] }
  0x1e   :  { %v87_v37 = vcombine.high %v79_v29, %v79_v29  ;;  %v104_v40 = vcombine.high %v96_v33, %v96_v33  ;;  %v86_v50 = vrot.slane %v72_v41, %v78_v17  ;;  %v54_v51 = vld [vmem:[#allocation2 + $0xb8] sm:$0xff]  ;;  %v103_v53 = vrot.slane %v89_v43, %v78_v17  ;;  %v53_v62 = vld [vmem:[#allocation2 + $0xb0] sm:$0xff] }
  0x1f   :  { %v62_v52 = vld [vmem:[#allocation2 + $0xf8] sm:$0xff]  ;;  %v425_v56 = vpack.c.bf16 %v58_v49, %v50_v48  ;;  %v61_v63 = vld [vmem:[#allocation2 + $0xf0] sm:$0xff]  ;;  %v427_v0 = vpack.c.bf16 %v57_v61, %v49_v60 }
  0x20   :  { %178 = vmatprep.mubr.f32.mxu1 %v87_v37  ;;  %318 = vmatprep.mubr.f32.mxu0 %v104_v40  ;;  %v441_v57 = vpack.c.bf16 %v62_v52, %v54_v51  ;;  %v88_v58 = vcombine.high %v86_v50, %v86_v50  ;;  %v105_v59 = vcombine.high %v103_v53, %v103_v53 }
  0x21   :  { %420 = vmatpush1.bf16.xpose.msra.mxu1 %v419_v36  ;;  %v443_v1 = vpack.c.bf16 %v61_v63, %v53_v62 }
  0x22   :  { %436 = vmatpush1.bf16.xpose.msra.mxu0 %v435_v38  ;;  %422 = vmatprep.subr.bf16.mxu1 %v421_v39 }
  0x23   :  { %438 = vmatprep.subr.bf16.mxu0 %v437_v42 }
  0x28   :  { %179 = vmatmul.mubr.f32.vlgmr.msra.gmra.mrb[0].mxu1 %v79_v29 }
  0x29   :  { %424 = vmatpush1.bf16.xpose.msra.mxu1 %v423_v54  ;;  %319 = vmatmul.mubr.f32.vlgmr.msra.gmra.mrb[0].mxu0 %v96_v33 }
  0x2a   :  { %440 = vmatpush1.bf16.xpose.msra.mxu0 %v439_v55  ;;  %426 = vmatprep.subr.bf16.mxu1 %v425_v56 }
  0x2b   :  { %442 = vmatprep.subr.bf16.mxu0 %v441_v57  ;;  %248 = vmatprep.mubr.f32.mxu1 %v88_v58 }
  0x2c   :  { %388 = vmatprep.mubr.f32.mxu0 %v105_v59 }
  0x31   :  { %428 = vmatpush1.bf16.xpose.msra.mxu1 %v427_v0 }
  0x32   :  { %444 = vmatpush1.bf16.xpose.msra.mxu0 %v443_v1 }
  0x38   :  { %249 = vmatmul.mubr.f32.vlgmr.msra.gmra.mrb[0].mxu1 %v86_v50 }
  0x39   :  { %389 = vmatmul.mubr.f32.vlgmr.msra.gmra.mrb[0].mxu0 %v103_v53 }
 0x10b   :  { %v250_v3 = vpop.f32.mrb[0].mxu1 }
 0x10c   :  { %v445_v4 = vadd.f32 %v412_v2, %v250_v3  ;;  %v390_v5 = vpop.f32.mrb[0].mxu0  ;;  %v252_v6 = vpop.f32.mrb[1].mxu1 }
 0x10d   :  { %v392_v7 = vpop.f32.mrb[1].mxu0 }
 0x10e   :  { %v446_v8 = vadd.f32 %v445_v4, %v390_v5 }
 0x110   :  { %v394_v9 = vmax.f32 %v446_v8, 0.0 }
 0x112   :  { %396 = vst.msk [vmem:[#allocation5] sm:$0x3] %vm395_vm0, %v394_v9 }
 0x113   :  { %491 = shalt.err (!%p488_p12)
}
 0x114   :  { %s492_s7 = scalar_lea.hbm %s567_s3, 32 }
 0x115   :  { %p493_p13 = scmp.ne.s32.totalorder %s567_s3, %s492_s7  ;;  %p496_p0 = scmp.lt.u32.totalorder %s492_s7, %s567_s3 }
 0x117   :  { %p498_p1 = pnand %p496_p0, %p493_p13 }
 0x119   :  { %501 = shalt.err (!%p498_p1)
}
 0x11a   :  { %406 = dma.vmem_to_hbm [thread:$0]  %s404_s4, 32, %s567_s3, [#allocation4]  }
 0x11b   :  { %504 = dma.done.wait [#allocation4], 32  }
 0x11c   :  { %505 = vsyncadd [#allocation4], 4294967264 }
 0x11d   :  { %410 = vsyncpa [#allocation3], 1 }
 0x11e   :  { %411 = vsyncpa [#allocation4], 1 }

</bundles_post_ra>
